<compile_context>
chip_gen: v7x
topology: tpu7x:2x2x1
jax: 0.10.0
libtpu: 0.0.40
codegen_flags: <defaults>
</compile_context>

<pallas_src>
import numpy as np
import jax
import jax.numpy as jnp
from jax.experimental import pallas as pl
from jax.experimental.pallas import tpu as pltpu


def _rate_est_kernel(p_ref, x_ref, o_ref):
    # p_ref: (R_blk, 16) pre-activated per-row params, columns:
    #   [softplus(h1..h4), b1..b4, tanh(a1..a3), pad x5]
    # x_ref / o_ref: (R_blk, C_blk) data block.
    x = x_ref[...].astype(jnp.float32)
    p = p_ref[...]

    def col(k):
        # (R_blk, 1) column, lane-broadcast against the (R_blk, C_blk) block.
        return p[:, k:k + 1]

    y = col(0) * x + col(4)                     # softplus(h1)*x + b1
    y = col(8) * jnp.tanh(y) + y                # tanh(a1)*tanh(y) + y
    y = col(1) * y + col(5)                     # softplus(h2)*y + b2
    y = col(9) * jnp.tanh(y) + y                # tanh(a2)*tanh(y) + y
    y = col(2) * y + col(6)                     # softplus(h3)*y + b3
    y = col(10) * jnp.tanh(y) + y               # tanh(a3)*tanh(y) + y
    y = col(3) * y + col(7)                     # softplus(h4)*y + b4

    # sigmoid(y) = 1 / (1 + exp(-y)).  Clip keeps exp(-y) finite so the
    # Newton refinement never multiplies inf * 0; the clipped result differs
    # from the exact sigmoid by < 1e-13 (far below the 1e-5 tolerance).
    y = jnp.clip(y, -30.0, 30.0)
    d = 1.0 + jnp.exp(-y)
    r = pl.reciprocal(d, approx=True)
    r = r * (2.0 - d * r)                       # one Newton step -> ~f32 exact
    o_ref[...] = r.astype(o_ref.dtype)


def _vmem_config():
    """Returns (per-data-block byte budget, vmem_limit_bytes)."""
    vmem_bytes = None
    try:
        vmem_bytes = getattr(pltpu.get_tpu_info(), "vmem_capacity_bytes", None)
    except Exception:
        pass
    if vmem_bytes is not None and vmem_bytes >= (128 << 20):
        # v5e / v6e class (128 MiB VMEM): HBM-bound here -> bigger blocks,
        # fewer grid steps, longer DMA bursts.
        return 6 << 20, 64 << 20
    # v7x-class (64 MiB VMEM/TC) or unknown: compute-bound / conservative.
    return 3 << 20, 32 << 20


def _choose_tiles(rows, cols, elem, budget):
    """Pick (tile_r, tile_c): lane dim kept wide, rows shrunk first."""
    if rows * cols * elem <= budget:
        return rows, cols                        # single full-extent block
    r_unit = 8 if rows >= 8 else rows            # smallest legal row block
    tile_c = cols
    if r_unit * cols * elem > budget and cols > 128:
        # Even 8 rows at full width overflow: tile lanes in 128-multiples,
        # but never narrower than 512 (lane-dense stores, long DMA segments).
        tile_c = (budget // (r_unit * elem)) // 128 * 128
        tile_c = int(min(cols, max(512, tile_c)))
    tile_r = (budget // (tile_c * elem)) // 8 * 8
    tile_r = int(max(r_unit, min(tile_r, rows)))
    return tile_r, tile_c


def rate_est_net(x, params):
    """params: tuple of 11 arrays, each (1, C, 1, 1): h1..h4, b1..b4, a1..a3."""
    b, c, h, w = x.shape
    rows, cols = b * c, h * w
    x2 = x.reshape(rows, cols)  # contiguous NCHW view -> (B*C, H*W)

    # Pre-activate the per-channel parameters once (O(11*C) work) and pack
    # them lane-dense as (rows, 16): [sp(h1..h4), b1..b4, tanh(a1..a3), pad].
    h1, h2, h3, h4, b1, b2, b3, b4, a1, a2, a3 = [
        jnp.reshape(p, (c,)).astype(jnp.float32) for p in params]
    p_c = jnp.stack([jax.nn.softplus(h1), jax.nn.softplus(h2),
                     jax.nn.softplus(h3), jax.nn.softplus(h4),
                     b1, b2, b3, b4,
                     jnp.tanh(a1), jnp.tanh(a2), jnp.tanh(a3)], axis=-1)
    p_c = jnp.pad(p_c, ((0, 0), (0, 5)))                       # (C, 16)
    p_rows = jnp.broadcast_to(p_c[None], (b, c, 16)).reshape(rows, 16)

    elem = x.dtype.itemsize
    budget, vmem_limit = _vmem_config()
    tile_r, tile_c = _choose_tiles(rows, cols, elem, budget)
    grid = (pl.cdiv(rows, tile_r), pl.cdiv(cols, tile_c))

    n = rows * cols
    cost = pl.CostEstimate(flops=18 * n, transcendentals=4 * n,
                           bytes_accessed=2 * n * elem + rows * 16 * 4)

    out = pl.pallas_call(
        _rate_est_kernel,
        out_shape=jax.ShapeDtypeStruct((rows, cols), x.dtype),
        grid_spec=pltpu.PrefetchScalarGridSpec(
            num_scalar_prefetch=0,
            grid=grid,
            in_specs=[
                pl.BlockSpec((tile_r, 16), lambda i, j: (i, 0)),
                pl.BlockSpec((tile_r, tile_c), lambda i, j: (i, j)),
            ],
            out_specs=pl.BlockSpec((tile_r, tile_c), lambda i, j: (i, j)),
        ),
        compiler_params=pltpu.CompilerParams(
            dimension_semantics=("parallel", "parallel"),
            vmem_limit_bytes=vmem_limit,
        ),
        cost_estimate=cost,
    )(p_rows, x2)
    return out.reshape(b, c, h, w)


def rate_est_net_reference(x, params):
    """Pure-JAX reference mirroring the PyTorch forward."""
    h1, h2, h3, h4, b1, b2, b3, b4, a1, a2, a3 = params
    sp = jax.nn.softplus
    y = sp(h1) * x + b1
    y = jnp.tanh(a1) * jnp.tanh(y) + y
    y = sp(h2) * y + b2
    y = jnp.tanh(a2) * jnp.tanh(y) + y
    y = sp(h3) * y + b3
    y = jnp.tanh(a3) * jnp.tanh(y) + y
    y = sp(h4) * y + b4
    return jax.nn.sigmoid(y)


if __name__ == "__main__":
    b, c, h, w = 2, 4, 16, 16
    key = jax.random.PRNGKey(0)
    keys = jax.random.split(key, 12)
    x = jax.random.normal(keys[0], (b, c, h, w), dtype=jnp.float32)
    # 11 per-channel parameters: h1..h4, b1..b4, a1..a3, each (1, C, 1, 1)
    params = tuple(
        jax.random.normal(keys[i + 1], (1, c, 1, 1), dtype=jnp.float32)
        for i in range(11)
    )

    out = jax.block_until_ready(rate_est_net(x, params))
    ref = jax.block_until_ready(rate_est_net_reference(x, params))

    assert out.shape == x.shape
    assert out.dtype == x.dtype
    np.testing.assert_allclose(np.asarray(out), np.asarray(ref),
                               rtol=1e-5, atol=1e-5)
    print("KERNEL_OK")
</pallas_src>

<mosaic_0001>
module attributes {stable_mosaic.version = 11 : i64} {
  func.func @_rate_est_kernel(%arg0: i32, %arg1: i32, %arg2: memref<8x16xf32, #tpu.memory_space<vmem>>, %arg3: memref<8x256xf32, #tpu.memory_space<vmem>>, %arg4: memref<8x256xf32, #tpu.memory_space<vmem>>) attributes {dimension_semantics = [#tpu.dimension_semantics<parallel>, #tpu.dimension_semantics<parallel>], iteration_bounds = array<i64: 1, 1>, scalar_prefetch = 0 : i64, scratch_operands = 0 : i64, tpu.core_type = #tpu.core_type<tc>, window_params = [{transform_indices = @transform_0, window_bounds = array<i64: 8, 16>}, {transform_indices = @transform_1, window_bounds = array<i64: 8, 256>}, {transform_indices = @transform_2, window_bounds = array<i64: 8, 256>}]} {
    %c0 = arith.constant 0 : index
    %c0_0 = arith.constant 0 : index
    %0 = vector.load %arg3[%c0, %c0_0] : memref<8x256xf32, #tpu.memory_space<vmem>>, vector<8x256xf32>
    %c0_1 = arith.constant 0 : index
    %c0_2 = arith.constant 0 : index
    %1 = vector.load %arg2[%c0_1, %c0_2] : memref<8x16xf32, #tpu.memory_space<vmem>>, vector<8x16xf32>
    %2 = vector.extract_strided_slice %1 {offsets = [0, 0], sizes = [8, 1], strides = [1, 1]} : vector<8x16xf32> to vector<8x1xf32>
    %3 = vector.broadcast %2 : vector<8x1xf32> to vector<8x256xf32>
    %4 = arith.mulf %3, %0 : vector<8x256xf32>
    %5 = vector.extract_strided_slice %1 {offsets = [0, 4], sizes = [8, 1], strides = [1, 1]} : vector<8x16xf32> to vector<8x1xf32>
    %6 = vector.broadcast %5 : vector<8x1xf32> to vector<8x256xf32>
    %7 = arith.addf %4, %6 : vector<8x256xf32>
    %8 = vector.extract_strided_slice %1 {offsets = [0, 8], sizes = [8, 1], strides = [1, 1]} : vector<8x16xf32> to vector<8x1xf32>
    %9 = math.tanh %7 : vector<8x256xf32>
    %10 = vector.broadcast %8 : vector<8x1xf32> to vector<8x256xf32>
    %11 = arith.mulf %10, %9 : vector<8x256xf32>
    %12 = arith.addf %11, %7 : vector<8x256xf32>
    %13 = vector.extract_strided_slice %1 {offsets = [0, 1], sizes = [8, 1], strides = [1, 1]} : vector<8x16xf32> to vector<8x1xf32>
    %14 = vector.broadcast %13 : vector<8x1xf32> to vector<8x256xf32>
    %15 = arith.mulf %14, %12 : vector<8x256xf32>
    %16 = vector.extract_strided_slice %1 {offsets = [0, 5], sizes = [8, 1], strides = [1, 1]} : vector<8x16xf32> to vector<8x1xf32>
    %17 = vector.broadcast %16 : vector<8x1xf32> to vector<8x256xf32>
    %18 = arith.addf %15, %17 : vector<8x256xf32>
    %19 = vector.extract_strided_slice %1 {offsets = [0, 9], sizes = [8, 1], strides = [1, 1]} : vector<8x16xf32> to vector<8x1xf32>
    %20 = math.tanh %18 : vector<8x256xf32>
    %21 = vector.broadcast %19 : vector<8x1xf32> to vector<8x256xf32>
    %22 = arith.mulf %21, %20 : vector<8x256xf32>
    %23 = arith.addf %22, %18 : vector<8x256xf32>
    %24 = vector.extract_strided_slice %1 {offsets = [0, 2], sizes = [8, 1], strides = [1, 1]} : vector<8x16xf32> to vector<8x1xf32>
    %25 = vector.broadcast %24 : vector<8x1xf32> to vector<8x256xf32>
    %26 = arith.mulf %25, %23 : vector<8x256xf32>
    %27 = vector.extract_strided_slice %1 {offsets = [0, 6], sizes = [8, 1], strides = [1, 1]} : vector<8x16xf32> to vector<8x1xf32>
    %28 = vector.broadcast %27 : vector<8x1xf32> to vector<8x256xf32>
    %29 = arith.addf %26, %28 : vector<8x256xf32>
    %30 = vector.extract_strided_slice %1 {offsets = [0, 10], sizes = [8, 1], strides = [1, 1]} : vector<8x16xf32> to vector<8x1xf32>
    %31 = math.tanh %29 : vector<8x256xf32>
    %32 = vector.broadcast %30 : vector<8x1xf32> to vector<8x256xf32>
    %33 = arith.mulf %32, %31 : vector<8x256xf32>
    %34 = arith.addf %33, %29 : vector<8x256xf32>
    %35 = vector.extract_strided_slice %1 {offsets = [0, 3], sizes = [8, 1], strides = [1, 1]} : vector<8x16xf32> to vector<8x1xf32>
    %36 = vector.broadcast %35 : vector<8x1xf32> to vector<8x256xf32>
    %37 = arith.mulf %36, %34 : vector<8x256xf32>
    %38 = vector.extract_strided_slice %1 {offsets = [0, 7], sizes = [8, 1], strides = [1, 1]} : vector<8x16xf32> to vector<8x1xf32>
    %39 = vector.broadcast %38 : vector<8x1xf32> to vector<8x256xf32>
    %40 = arith.addf %37, %39 : vector<8x256xf32>
    %cst = arith.constant -3.000000e+01 : f32
    %cst_3 = arith.constant 3.000000e+01 : f32
    %41 = vector.broadcast %cst : f32 to vector<8x256xf32>
    %42 = arith.maximumf %41, %40 : vector<8x256xf32>
    %43 = vector.broadcast %cst_3 : f32 to vector<8x256xf32>
    %44 = arith.minimumf %43, %42 : vector<8x256xf32>
    %cst_4 = arith.constant 0.000000e+00 : f32
    %45 = vector.broadcast %cst_4 : f32 to vector<8x256xf32>
    %46 = arith.subf %45, %44 : vector<8x256xf32>
    %47 = math.exp %46 : vector<8x256xf32>
    %cst_5 = arith.constant 1.000000e+00 : f32
    %48 = vector.broadcast %cst_5 : f32 to vector<8x256xf32>
    %49 = arith.addf %48, %47 : vector<8x256xf32>
    %50 = tpu.reciprocal %49 {approx = true} : vector<8x256xf32> -> vector<8x256xf32>
    %51 = arith.mulf %49, %50 : vector<8x256xf32>
    %cst_6 = arith.constant 2.000000e+00 : f32
    %52 = vector.broadcast %cst_6 : f32 to vector<8x256xf32>
    %53 = arith.subf %52, %51 : vector<8x256xf32>
    %54 = arith.mulf %50, %53 : vector<8x256xf32>
    %c0_7 = arith.constant 0 : index
    %c0_8 = arith.constant 0 : index
    %55 = vector.load %arg4[%c0_7, %c0_8] : memref<8x256xf32, #tpu.memory_space<vmem>>, vector<8x256xf32>
    tpu.vector_store %arg4[%c0_7, %c0_8], %54 {strides = array<i32>} : memref<8x256xf32, #tpu.memory_space<vmem>>, vector<8x256xf32>,
    return
  }
  func.func @transform_0(%arg0: i32, %arg1: i32) -> (i32, i32) {
    %c0_i32 = arith.constant 0 : i32
    %c0_i32_0 = arith.constant 0 : i32
    return %arg0, %c0_i32 : i32, i32
  }
  func.func @transform_1(%arg0: i32, %arg1: i32) -> (i32, i32) {
    %c0_i32 = arith.constant 0 : i32
    return %arg0, %arg1 : i32, i32
  }
  func.func @transform_2(%arg0: i32, %arg1: i32) -> (i32, i32) {
    %c0_i32 = arith.constant 0 : i32
    return %arg0, %arg1 : i32, i32
  }
}

</mosaic_0001>

<bundles_post_ra>
// kernel: tpu_custom_call.1
= control target key start
LH: loop header
LB: loop body
LE: loop exit
PB: predicated region body
PF: predicated region fallthrough
CT: control target
= control target key end

     0   :  { %7 = vsyncpa [#allocation3], 0  ;;  %s341_s0 = inlined_call_operand.hbm [shape: f32[8,16], index: 0, kind: input, shape index: {}]   ;;  %s342_s1 = inlined_call_operand.hbm [shape: f32[8,256], index: 1, kind: input, shape index: {}]   ;;  %s343_s2 = inlined_call_operand.hbm [shape: f32[8,256], index: 2, kind: output, shape index: {}]  }
   0x1   :  { %8 = vsyncpa [#allocation6], 0 }
   0x2   :  { %9 = vsyncpa [#allocation4], 0  ;;  %s276_s9 = smov [#allocation2]   ;;  %s277_s11 = smov [#allocation5]  }
   0x3   :  { %s16_s10 = sshll.u32 %s276_s9, 4  ;;  %s26_s12 = sshll.u32 %s277_s11, 4  ;;  %s17_s10 = int_to_ptr.vmem [resolvable:$true] %s16_s10  ;;  %s27_s12 = int_to_ptr.vmem [resolvable:$true] %s26_s12 }
   0x4   :  { %s204_s15 = scalar_lea.hbm %s341_s0, 128 }
   0x5   :  { %p205_p0 = scmp.ne.s32.totalorder %s341_s0, %s204_s15  ;;  %p208_p1 = scmp.lt.u32.totalorder %s204_s15, %s341_s0 }
   0x7   :  { %p210_p2 = pnand %p208_p1, %p205_p0 }
   0x9   :  { %213 = shalt.err (!%p210_p2)
}
   0xa   :  { %s214_s20 = scalar_lea.vmem %s17_s10, 128  ;;  %p219_p4 = scmp.lt.s32.totalorder %s17_s10, %s17_s10 }
   0xb   :  { %p215_p3 = scmp.ne.s32.totalorder %s17_s10, %s214_s20  ;;  %p220_p5 = scmp.lt.s32.totalorder %s214_s20, %s214_s20 }
   0xd   :  { %p221_p6 = por %p220_p5, %p219_p4 }
   0xf   :  { %p222_p7 = pnand %p221_p6, %p215_p3 }
  0x11   :  { %225 = shalt.err (!%p222_p7)
}
  0x12   :  { %19 = dma.hbm_to_vmem [thread:$0]  %s341_s0, 128, %s17_s10, [#allocation3]  }
  0x13   :  { %s226_s25 = scalar_lea.hbm %s342_s1, 256 }
  0x14   :  { %p227_p8 = scmp.ne.s32.totalorder %s342_s1, %s226_s25  ;;  %p230_p9 = scmp.lt.u32.totalorder %s226_s25, %s342_s1 }
  0x16   :  { %p232_p10 = pnand %p230_p9, %p227_p8 }
  0x18   :  { %235 = shalt.err (!%p232_p10)
}
  0x19   :  { %s236_s30 = scalar_lea.vmem %s27_s12, 256  ;;  %p241_p12 = scmp.lt.s32.totalorder %s27_s12, %s27_s12 }
  0x1a   :  { %p237_p11 = scmp.ne.s32.totalorder %s27_s12, %s236_s30  ;;  %p242_p13 = scmp.lt.s32.totalorder %s236_s30, %s236_s30 }
  0x1c   :  { %p243_p0 = por %p242_p13, %p241_p12 }
  0x1e   :  { %p244_p1 = pnand %p243_p0, %p237_p11 }
  0x20   :  { %247 = shalt.err (!%p244_p1)
}
  0x21   :  { %29 = dma.hbm_to_vmem [thread:$0]  %s342_s1, 256, %s27_s12, [#allocation6]  }
  0x22   :  { %270 = dma.done.wait [#allocation3], 128  }
  0x23   :  { %271 = vsyncadd [#allocation3], 4294967168 }
  0x24   :  { %272 = dma.done.wait [#allocation6], 256  }
  0x25   :  { %273 = vsyncadd [#allocation6], 4294967040  ;;  %v278_v0 = vmov 0   ;;  %v279_v1 = vmov 8   ;;  %v38_v2 = vld [vmem:[#allocation2] sm:$0xff]  ;;  %v280_v3 = vmov 4  }
  0x26   :  { %172 = vset.pattern.permute.xlu0 %v278_v0  ;;  %174 = vset.pattern.permute.xlu1 %v279_v1  ;;  %v281_v4 = vmov 1   ;;  %v282_v5 = vmov 5   ;;  %v283_v6 = vmov 9   ;;  %v284_v7 = vmov 2   ;;  %v36_v13 = vld [vmem:[#allocation5] sm:$0xff]  ;;  %v37_v14 = vld [vmem:[#allocation5 + $0x8] sm:$0xff] }
  0x27   :  { %41 = vperm.xlu0 %172, %v38_v2   ;;  %55 = vperm.xlu1 %174, %v38_v2   ;;  %v285_v8 = vmov 10   ;;  %v286_v9 = vmov 6   ;;  %v287_v10 = vmov 7   ;;  %v288_v11 = vmov 3   ;;  %s289_s1 = smov [#allocation7]  }
  0x28   :  { %s146_s4 = sshll.u32 %s289_s1, 4  ;;  %s147_s4 = int_to_ptr.vmem [resolvable:$true] %s146_s4 }
  0x29   :  { %s248_s5 = scalar_lea.vmem %s147_s4, 256  ;;  %p253_p3 = scmp.lt.s32.totalorder %s147_s4, %s147_s4 }
  0x2a   :  { %p249_p2 = scmp.ne.s32.totalorder %s147_s4, %s248_s5  ;;  %p254_p4 = scmp.lt.s32.totalorder %s248_s5, %s248_s5 }
  0x2b   :  { %173 = vset.pattern.permute.xlu0 %v280_v3  ;;  %175 = vset.pattern.permute.xlu1 %v281_v4 }
  0x2c   :  { %47 = vperm.xlu0 %173, %v38_v2   ;;  %63 = vperm.xlu1 %175, %v38_v2   ;;  %p255_p5 = por %p254_p4, %p253_p3 }
  0x2e   :  { %p256_p6 = pnand %p255_p5, %p249_p2 }
  0x30   :  { %176 = vset.pattern.permute.xlu1 %v282_v5  ;;  %177 = vset.pattern.permute.xlu0 %v283_v6 }
  0x31   :  { %69 = vperm.xlu1 %176, %v38_v2   ;;  %77 = vperm.xlu0 %177, %v38_v2  }
  0x35   :  { %178 = vset.pattern.permute.xlu1 %v284_v7  ;;  %180 = vset.pattern.permute.xlu0 %v285_v8 }
  0x36   :  { %85 = vperm.xlu1 %178, %v38_v2   ;;  %99 = vperm.xlu0 %180, %v38_v2  }
  0x3a   :  { %179 = vset.pattern.permute.xlu1 %v286_v9  ;;  %183 = vset.pattern.permute.xlu0 %v287_v10 }
  0x3b   :  { %91 = vperm.xlu1 %179, %v38_v2  }
  0x3f   :  { %181 = vset.pattern.permute.xlu1 %v288_v11 }
  0x40   :  { %107 = vperm.xlu1 %181, %v38_v2  }
  0x44   :  { %182 = vset.pattern.permute.xlu1 %v287_v10 }
  0x45   :  { %113 = vperm.xlu1 %182, %v38_v2  }
  0xa6   :  { %v42_v12 = vpop.permute.xlu0 %41  ;;  %v56_v20 = vpop.permute.xlu1 %55 }
  0xa7   :  { %v44_v15 = vmul.f32 %v42_v12, %v36_v13  ;;  %v45_v16 = vmul.f32 %v42_v12, %v37_v14 }
  0xab   :  { %v48_v17 = vpop.permute.xlu0 %47  ;;  %v64_v21 = vpop.permute.xlu1 %63 }
  0xac   :  { %v50_v18 = vadd.f32 %v48_v17, %v44_v15  ;;  %v51_v19 = vadd.f32 %v48_v17, %v45_v16 }
  0xae   :  { %184 = vtanh.f32 %v50_v18 }
  0xaf   :  { %186 = vtanh.f32 %v51_v19 }
  0xb0   :  { %v70_v28 = vpop.permute.xlu1 %69  ;;  %v78_v33 = vpop.permute.xlu0 %77 }
  0xb5   :  { %v86_v34 = vpop.permute.xlu1 %85  ;;  %v100_v46 = vpop.permute.xlu0 %99 }
  0xb8   :  { %v185_v22 = vpop.eup %184 }
  0xb9   :  { %v187_v23 = vpop.eup %186  ;;  %v58_v24 = vmul.f32 %v185_v22, %v56_v20 }
  0xba   :  { %v59_v25 = vmul.f32 %v187_v23, %v56_v20  ;;  %v92_v41 = vpop.permute.xlu1 %91 }
  0xbb   :  { %v60_v26 = vadd.f32 %v58_v24, %v50_v18 }
  0xbc   :  { %v61_v27 = vadd.f32 %v59_v25, %v51_v19 }
  0xbd   :  { %v66_v29 = vmul.f32 %v64_v21, %v60_v26 }
  0xbe   :  { %v67_v30 = vmul.f32 %v64_v21, %v61_v27 }
  0xbf   :  { %v72_v31 = vadd.f32 %v70_v28, %v66_v29  ;;  %v108_v47 = vpop.permute.xlu1 %107 }
  0xc0   :  { %v73_v32 = vadd.f32 %v70_v28, %v67_v30 }
  0xc1   :  { %188 = vtanh.f32 %v72_v31 }
  0xc2   :  { %190 = vtanh.f32 %v73_v32 }
  0xc4   :  { %v114_v54 = vpop.permute.xlu1 %113 }
  0xcb   :  { %v189_v35 = vpop.eup %188 }
  0xcc   :  { %v191_v36 = vpop.eup %190  ;;  %v80_v37 = vmul.f32 %v189_v35, %v78_v33 }
  0xcd   :  { %v81_v38 = vmul.f32 %v191_v36, %v78_v33 }
  0xce   :  { %v82_v39 = vadd.f32 %v80_v37, %v72_v31 }
  0xcf   :  { %v83_v40 = vadd.f32 %v81_v38, %v73_v32 }
  0xd0   :  { %v88_v42 = vmul.f32 %v86_v34, %v82_v39 }
  0xd1   :  { %v89_v43 = vmul.f32 %v86_v34, %v83_v40 }
  0xd2   :  { %v94_v44 = vadd.f32 %v92_v41, %v88_v42 }
  0xd3   :  { %v95_v45 = vadd.f32 %v92_v41, %v89_v43 }
  0xd4   :  { %192 = vtanh.f32 %v94_v44 }
  0xd5   :  { %194 = vtanh.f32 %v95_v45 }
  0xde   :  { %v193_v48 = vpop.eup %192 }
  0xdf   :  { %v195_v49 = vpop.eup %194  ;;  %v102_v50 = vmul.f32 %v193_v48, %v100_v46 }
  0xe0   :  { %v103_v51 = vmul.f32 %v195_v49, %v100_v46 }
  0xe1   :  { %v104_v52 = vadd.f32 %v102_v50, %v94_v44 }
  0xe2   :  { %v105_v53 = vadd.f32 %v103_v51, %v95_v45 }
  0xe3   :  { %v110_v55 = vmul.f32 %v108_v47, %v104_v52 }
  0xe4   :  { %v111_v56 = vmul.f32 %v108_v47, %v105_v53 }
  0xe5   :  { %v116_v57 = vadd.f32 %v114_v54, %v110_v55 }
  0xe6   :  { %v117_v58 = vadd.f32 %v114_v54, %v111_v56 }
  0xe7   :  { %v156_v59 = vclamps-f32 %v116_v57, 30.0 }
  0xe8   :  { %v157_v60 = vclamps-f32 %v117_v58, 30.0 }
  0xe9   :  { %v122_v61 = vsub.f32 0.0, %v156_v59 }
  0xea   :  { %v123_v62 = vsub.f32 0.0, %v157_v60 }
  0xeb   :  { %v124_v63 = vmul.f32 1.442695, %v122_v61 }
  0xec   :  { %v126_v0 = vmul.f32 1.442695, %v123_v62 }
  0xed   :  { %196 = vpow2.f32 %v124_v63 }
  0xee   :  { %198 = vpow2.f32 %v126_v0 }
  0xf7   :  { %v197_v1 = vpop.eup %196 }
  0xf8   :  { %v199_v2 = vpop.eup %198  ;;  %v128_v3 = vadd.f32 1.0, %v197_v1 }
  0xf9   :  { %v129_v4 = vadd.f32 1.0, %v199_v2 }
  0xfa   :  { %200 = vrcp.f32 %v128_v3 }
  0xfb   :  { %202 = vrcp.f32 %v129_v4 }
 0x104   :  { %v201_v5 = vpop.eup %200 }
 0x105   :  { %v203_v6 = vpop.eup %202  ;;  %v132_v7 = vmul.f32 %v201_v5, %v128_v3 }
 0x106   :  { %v133_v8 = vmul.f32 %v203_v6, %v129_v4 }
 0x107   :  { %v134_v9 = vsub.f32 2.0, %v132_v7 }
 0x108   :  { %v135_v10 = vsub.f32 2.0, %v133_v8 }
 0x109   :  { %v136_v11 = vmul.f32 %v201_v5, %v134_v9 }
 0x10a   :  { %v137_v12 = vmul.f32 %v203_v6, %v135_v10 }
 0x10b   :  { %138 = vst [vmem:[#allocation7] sm:$0xff] %v136_v11 }
 0x10c   :  { %139 = vst [vmem:[#allocation7 + $0x8] sm:$0xff] %v137_v12 }
 0x10d   :  { %259 = shalt.err (!%p256_p6)
}
 0x10e   :  { %s260_s8 = scalar_lea.hbm %s343_s2, 256 }
 0x10f   :  { %p261_p7 = scmp.ne.s32.totalorder %s343_s2, %s260_s8  ;;  %p264_p8 = scmp.lt.u32.totalorder %s260_s8, %s343_s2 }
 0x111   :  { %p266_p9 = pnand %p264_p8, %p261_p7 }
 0x113   :  { %269 = shalt.err (!%p266_p9)
}
 0x114   :  { %149 = dma.vmem_to_hbm [thread:$0]  %s147_s4, 256, %s343_s2, [#allocation4]  }
 0x115   :  { %274 = dma.done.wait [#allocation4], 256  }
 0x116   :  { %275 = vsyncadd [#allocation4], 4294967040 }
 0x117   :  { %153 = vsyncpa [#allocation3], 1 }
 0x118   :  { %154 = vsyncpa [#allocation6], 1 }
 0x119   :  { %155 = vsyncpa [#allocation4], 1 }

</bundles_post_ra>
